<compile_context>
chip_gen: v5e
topology: v5e:2x2
jax: 0.10.0
libtpu: 0.0.40
codegen_flags: <defaults>
</compile_context>

<pallas_src>
import functools
import math

import jax
import jax.numpy as jnp
import numpy as np
from jax.experimental import pallas as pl
from jax.experimental.pallas import tpu as pltpu

LN_EPS = 1e-12                      # BERT default

_VMEM_LIMIT = None


def _vmem_limit_bytes():
    """~3/4 of physical VMEM: ~96 MiB on v5e/v6e (128 MiB), ~48 MiB on v7x (64 MiB)."""
    global _VMEM_LIMIT
    if _VMEM_LIMIT is None:
        cap = 64 * 1024 * 1024
        try:
            cap = int(getattr(pltpu.get_tpu_info(), "vmem_capacity_bytes", cap))
        except Exception:
            pass
        _VMEM_LIMIT = int(min(cap * 3 // 4, 100 * 1024 * 1024))
    return _VMEM_LIMIT


def _compiler_params():
    return pltpu.CompilerParams(
        dimension_semantics=("parallel",),
        vmem_limit_bytes=_vmem_limit_bytes(),
    )


def _nbytes(x):
    return int(x.size) * int(x.dtype.itemsize)


# --------------------------------------------------------------------------
# In-kernel helpers
# --------------------------------------------------------------------------
def _layernorm(x, gamma, beta):
    """Two-pass LayerNorm ((x-mu)^2 variance, always >= 0), f32 statistics."""
    mu = jnp.mean(x, axis=-1, keepdims=True)
    xc = x - mu
    var = jnp.mean(xc * xc, axis=-1, keepdims=True)
    inv = jax.lax.rsqrt(var + LN_EPS)
    return xc * inv * gamma + beta


# --------------------------------------------------------------------------
# Kernels
# --------------------------------------------------------------------------
def embed_ln_kernel(e_ref, g_ref, b_ref, out_ref):
    # f32 embedding sums in, bf16 residual-stream activations out.
    out_ref[...] = _layernorm(e_ref[...], g_ref[...], b_ref[...]).astype(out_ref.dtype)


def qkv_dense_kernel(x_ref, w_ref, b_ref, out_ref):
    # bf16 x bf16 MXU feed, f32 accumulation, bf16 boundary output.
    y = jnp.dot(x_ref[...], w_ref[...], preferred_element_type=jnp.float32)
    out_ref[...] = (y + b_ref[...]).astype(out_ref.dtype)


def attn_outproj_ln_kernel(mask_ref, qkv_ref, x_ref, wo_ref, bo_ref, g_ref, b_ref,
                           out_ref, *, num_heads, head_dim):
    # One batch element per grid step.
    #   qkv_ref: (1, L, 3H) bf16   mask_ref: (1, 1, L) f32 additive
    #   x_ref  : (1, L, H)  bf16   output  : (1, L, H)  bf16
    # Heads are sliced in-register; the per-head context is immediately folded
    # into the output projection (ctx_h @ wo[h*hd:(h+1)*hd, :]) so the only
    # store is the lane-dense (L, H) block.
    H = num_heads * head_dim
    qkv = qkv_ref[0]                               # (L, 3H) bf16
    mask = mask_ref[0]                             # (1, L)  f32
    L = qkv.shape[0]

    y = jnp.zeros((L, H), jnp.float32)
    for h in range(num_heads):                     # static unroll over heads
        lo = h * head_dim
        hi = lo + head_dim
        q = qkv[:, lo:hi]                          # (L, hd) bf16 (scale folded in)
        k = qkv[:, H + lo:H + hi]
        v = qkv[:, 2 * H + lo:2 * H + hi]
        s = jax.lax.dot_general(q, k, (((1,), (1,)), ((), ())),
                                preferred_element_type=jnp.float32)   # (L, L)
        s = s + mask                               # additive key mask
        m = jnp.max(s, axis=-1, keepdims=True)     # stable softmax, f32 stats
        e = jnp.exp(s - m)
        denom = jnp.sum(e, axis=-1, keepdims=True)
        p = (e * pl.reciprocal(denom, approx=True)).astype(jnp.bfloat16)
        ctx_h = jnp.dot(p, v, preferred_element_type=jnp.float32)     # (L, hd)
        y = y + jnp.dot(ctx_h.astype(jnp.bfloat16), wo_ref[lo:hi, :],
                        preferred_element_type=jnp.float32)           # (L, H)

    resid = x_ref[0].astype(jnp.float32) + y + bo_ref[...]
    out_ref[0] = _layernorm(resid, g_ref[...], b_ref[...]).astype(out_ref.dtype)


def ffn_ln_kernel(h_ref, w1_ref, b1_ref, w2_ref, b2_ref, g_ref, b_ref, out_ref):
    h = h_ref[...]                                              # (tr, H) bf16
    ff = jnp.dot(h, w1_ref[...], preferred_element_type=jnp.float32) + b1_ref[...]
    # TODO(synk): HF BERT uses exact erf-GELU; tanh approximation kept for robust Mosaic lowering.
    ff = jax.nn.gelu(ff, approximate=True)
    y = jnp.dot(ff.astype(jnp.bfloat16), w2_ref[...],
                preferred_element_type=jnp.float32) + b2_ref[...]
    out_ref[...] = _layernorm(h.astype(jnp.float32) + y,
                              g_ref[...], b_ref[...]).astype(out_ref.dtype)


def pooler_fc_kernel(cls_ref, wp_ref, bp_ref, wfc_ref, bfc_ref, out_ref):
    # BERT pooler (dense + tanh on [CLS]) followed by the SoftmaxNN classifier.
    pooled = jnp.tanh(jnp.dot(cls_ref[...], wp_ref[...],
                              preferred_element_type=jnp.float32) + bp_ref[...])
    # TODO(synk): nn.Dropout is identity at inference; train-mode masking would
    # use pltpu.prng_seed + pltpu.prng_random_bits here.
    out_ref[...] = jnp.dot(pooled.astype(jnp.bfloat16), wfc_ref[...],
                           preferred_element_type=jnp.float32) + bfc_ref[...]


# --------------------------------------------------------------------------
# pallas_call wrappers
# --------------------------------------------------------------------------
def _pick_row_tile(n_rows, target=512):
    """Largest row tile <= target dividing n_rows; prefers >= 2 grid steps and
    bf16-friendly (multiple-of-16) sublane counts, falling back to 8."""
    for multiple in (16, 8):
        cap = min(target, n_rows // 2) if n_rows >= 2 * multiple else min(target, n_rows)
        start = cap - cap % multiple
        for tr in range(start, 0, -multiple):
            if n_rows % tr == 0:
                return tr
    return n_rows


def _row_call(kernel, row_inputs, resident_inputs, *, out_cols, out_dtype):
    """Row-tiled pallas_call: activations tiled over rows, weights resident.

    Resident weights use a constant (0,0) index map; Mosaic keeps them in VMEM
    across grid steps (no re-fetch).  # TODO(synk): on v7x, single-buffering the
    constant-index weights (pl.Buffered(1)) would free a few MiB more VMEM.
    """
    n_rows = row_inputs[0].shape[0]
    tr = _pick_row_tile(n_rows)
    in_specs = (
        [pl.BlockSpec((tr, a.shape[1]), lambda i: (i, 0)) for a in row_inputs]
        + [pl.BlockSpec(w.shape, lambda i: (0, 0)) for w in resident_inputs]
    )
    flops = 2 * n_rows * sum(int(w.shape[0]) * int(w.shape[1])
                             for w in resident_inputs
                             if w.ndim == 2 and w.shape[0] > 1)
    bytes_accessed = (sum(_nbytes(a) for a in row_inputs)
                      + sum(_nbytes(w) for w in resident_inputs)
                      + n_rows * out_cols * int(np.dtype(out_dtype).itemsize))
    return pl.pallas_call(
        kernel,
        grid=(n_rows // tr,),
        in_specs=in_specs,
        out_specs=pl.BlockSpec((tr, out_cols), lambda i: (i, 0)),
        out_shape=jax.ShapeDtypeStruct((n_rows, out_cols), out_dtype),
        compiler_params=_compiler_params(),
        cost_estimate=pl.CostEstimate(flops=int(flops), transcendentals=0,
                                      bytes_accessed=int(bytes_accessed)),
    )(*row_inputs, *resident_inputs)


def attention_block(qkv_b, x_b, mask_b, layer, *, num_heads, head_dim):
    """Per-batch fused attention + output projection + residual + LayerNorm."""
    B, L, H = x_b.shape
    kernel = functools.partial(attn_outproj_ln_kernel,
                               num_heads=num_heads, head_dim=head_dim)

    def blk3(arr):
        return pl.BlockSpec((1,) + arr.shape[1:], lambda b: (b, 0, 0))

    flops = (2 * B * num_heads * 2 * L * L * head_dim   # QK^T and PV
             + 2 * B * L * H * H)                       # output projection
    bytes_accessed = (_nbytes(qkv_b) + _nbytes(x_b) + _nbytes(mask_b)
                      + _nbytes(layer["wo"]) + B * L * H * 2)
    return pl.pallas_call(
        kernel,
        grid=(B,),
        in_specs=[blk3(mask_b), blk3(qkv_b), blk3(x_b),
                  pl.BlockSpec(layer["wo"].shape, lambda b: (0, 0)),
                  pl.BlockSpec(layer["bo"].shape, lambda b: (0, 0)),
                  pl.BlockSpec(layer["ln1_g"].shape, lambda b: (0, 0)),
                  pl.BlockSpec(layer["ln1_b"].shape, lambda b: (0, 0))],
        out_specs=pl.BlockSpec((1, L, H), lambda b: (b, 0, 0)),
        out_shape=jax.ShapeDtypeStruct((B, L, H), jnp.bfloat16),
        compiler_params=_compiler_params(),
        cost_estimate=pl.CostEstimate(flops=int(flops),
                                      transcendentals=int(B * num_heads * L * L),
                                      bytes_accessed=int(bytes_accessed)),
    )(mask_b, qkv_b, x_b, layer["wo"], layer["bo"],
      layer["ln1_g"], layer["ln1_b"])


def bert_layer(x_rows, mask_b, layer, *, B, L, num_heads, head_dim):
    H = x_rows.shape[1]

    # fused QKV projection: one (B*L, H) @ (H, 3H) matmul, bf16 in/out
    qkv = _row_call(qkv_dense_kernel, [x_rows], [layer["w_qkv"], layer["b_qkv"]],
                    out_cols=3 * H, out_dtype=jnp.bfloat16)

    # free reshapes only (no transposes): rows -> (B, L, .)
    qkv_b = qkv.reshape(B, L, 3 * H)
    x_b = x_rows.reshape(B, L, H)

    # per-batch attention + fused output projection + residual + LayerNorm
    h1 = attention_block(qkv_b, x_b, mask_b, layer,
                         num_heads=num_heads, head_dim=head_dim).reshape(B * L, H)

    # FFN (row-tiled so the (rows, I) intermediate stays bounded) + residual + LN
    return _row_call(ffn_ln_kernel, [h1],
                     [layer["w1"], layer["b1"], layer["w2"], layer["b2"],
                      layer["ln2_g"], layer["ln2_b"]],
                     out_cols=H, out_dtype=jnp.bfloat16)


# --------------------------------------------------------------------------
# Parameters (synthetic, shapes follow BertModel + SoftmaxNN.fc)
# --------------------------------------------------------------------------
def init_params(key, *, vocab, max_pos, type_vocab, H, I, n_layers, n_heads,
                num_class):
    hd = H // n_heads
    std = 0.02
    keys = iter(jax.random.split(key, 16 + 8 * n_layers))

    def normal(shape):
        return jax.random.normal(next(keys), shape, jnp.float32) * std

    bf16 = lambda x: x.astype(jnp.bfloat16)

    params = {
        "word_emb": normal((vocab, H)),
        "pos_emb": normal((max_pos, H)),
        "type_emb": normal((type_vocab, H)),
        "emb_ln_g": jnp.ones((1, H), jnp.float32),
        "emb_ln_b": jnp.zeros((1, H), jnp.float32),
        "pooler_w": bf16(normal((H, H))),
        "pooler_b": jnp.zeros((1, H), jnp.float32),
        "fc_w": bf16(normal((H, num_class))),           # SoftmaxNN classifier
        "fc_b": jnp.zeros((1, num_class), jnp.float32),
        "layers": [],
    }
    scale = 1.0 / math.sqrt(hd)
    for _ in range(n_layers):
        wq, wk, wv = normal((H, H)), normal((H, H)), normal((H, H))
        # fold the 1/sqrt(head_dim) attention scale into the Q projection once
        w_qkv = jnp.concatenate([wq * scale, wk, wv], axis=1)
        params["layers"].append({
            "w_qkv": bf16(w_qkv),
            "b_qkv": jnp.zeros((1, 3 * H), jnp.float32),
            "wo": bf16(normal((H, H))), "bo": jnp.zeros((1, H), jnp.float32),
            "ln1_g": jnp.ones((1, H), jnp.float32),
            "ln1_b": jnp.zeros((1, H), jnp.float32),
            "w1": bf16(normal((H, I))), "b1": jnp.zeros((1, I), jnp.float32),
            "w2": bf16(normal((I, H))), "b2": jnp.zeros((1, H), jnp.float32),
            "ln2_g": jnp.ones((1, H), jnp.float32),
            "ln2_b": jnp.zeros((1, H), jnp.float32),
        })
    return params


# --------------------------------------------------------------------------
# SoftmaxNN.forward equivalent
# --------------------------------------------------------------------------
def softmax_nn_forward(token, att_mask, params, *, num_heads):
    """logits = fc(dropout(BERT(token, att_mask).pooled));  dropout = identity (eval)."""
    B, L = token.shape
    H = params["word_emb"].shape[1]
    hd = H // num_heads

    # glue: embedding lookups (word + position + token_type=0)
    emb = (jnp.take(params["word_emb"], token, axis=0)
           + params["pos_emb"][None, :L, :]
           + params["type_emb"][0][None, None, :]).astype(jnp.float32)
    emb_rows = emb.reshape(B * L, H)

    x_rows = _row_call(embed_ln_kernel, [emb_rows],
                       [params["emb_ln_g"], params["emb_ln_b"]],
                       out_cols=H, out_dtype=jnp.bfloat16)

    # additive attention mask (0 content / -1e9 padding), one copy per batch
    mask_b = ((1.0 - att_mask.astype(jnp.float32)) * -1e9).reshape(B, 1, L)

    # TODO(synk): stacking per-layer weights with a layer grid axis (or cross-call
    # prefetch, P10) would hide per-layer weight DMA; kept as per-layer calls here.
    for layer in params["layers"]:
        x_rows = bert_layer(x_rows, mask_b, layer,
                            B=B, L=L, num_heads=num_heads, head_dim=hd)

    cls_rows = x_rows.reshape(B, L, H)[:, 0, :]                 # (B, H) bf16
    logits = _row_call(pooler_fc_kernel, [cls_rows],
                       [params["pooler_w"], params["pooler_b"],
                        params["fc_w"], params["fc_b"]],
                       out_cols=params["fc_w"].shape[1], out_dtype=jnp.float32)
    return logits                                               # (B, num_class)


# --------------------------------------------------------------------------
if __name__ == "__main__":
    # Small synthetic config (B*L = 32 rows -> row grid of 2, attention grid of 2)
    B, L = 2, 16
    H, I = 32, 64
    NUM_HEADS, N_LAYERS = 2, 2
    VOCAB, MAX_POS, TYPE_VOCAB = 100, 32, 2
    NUM_CLASS = 5                       # len(rel2id)

    key = jax.random.PRNGKey(0)
    k_tok, k_params = jax.random.split(key)

    token = jax.random.randint(k_tok, (B, L), 0, VOCAB, dtype=jnp.int32)
    lengths = jnp.array([L, 10], dtype=jnp.int32)
    att_mask = (jnp.arange(L)[None, :] < lengths[:, None]).astype(jnp.int32)

    params = init_params(k_params, vocab=VOCAB, max_pos=MAX_POS,
                         type_vocab=TYPE_VOCAB, H=H, I=I, n_layers=N_LAYERS,
                         n_heads=NUM_HEADS, num_class=NUM_CLASS)

    logits = softmax_nn_forward(token, att_mask, params, num_heads=NUM_HEADS)
    logits = jax.block_until_ready(logits)

    assert logits.shape == (B, NUM_CLASS) and logits.dtype == jnp.float32
    assert bool(jnp.all(jnp.isfinite(logits)))
    print("KERNEL_OK")
</pallas_src>

<mosaic_0001>
module attributes {stable_mosaic.version = 11 : i64} {
  func.func @embed_ln_kernel(%arg0: i32, %arg1: memref<16x32xf32, #tpu.memory_space<vmem>>, %arg2: memref<1x32xf32, #tpu.memory_space<vmem>>, %arg3: memref<1x32xf32, #tpu.memory_space<vmem>>, %arg4: memref<16x32xbf16, #tpu.memory_space<vmem>>) attributes {dimension_semantics = [#tpu.dimension_semantics<parallel>], iteration_bounds = array<i64: 2>, scalar_prefetch = 0 : i64, scratch_operands = 0 : i64, tpu.core_type = #tpu.core_type<tc>, window_params = [{transform_indices = @transform_0, window_bounds = array<i64: 16, 32>}, {pipeline_mode = #tpu.pipeline_mode<synchronous>, transform_indices = @transform_1, window_bounds = array<i64: 1, 32>}, {pipeline_mode = #tpu.pipeline_mode<synchronous>, transform_indices = @transform_2, window_bounds = array<i64: 1, 32>}, {transform_indices = @transform_3, window_bounds = array<i64: 16, 32>}]} {
    %c0 = arith.constant 0 : index
    %c0_0 = arith.constant 0 : index
    %0 = vector.load %arg1[%c0, %c0_0] : memref<16x32xf32, #tpu.memory_space<vmem>>, vector<16x32xf32>
    %c0_1 = arith.constant 0 : index
    %c0_2 = arith.constant 0 : index
    %1 = vector.load %arg2[%c0_1, %c0_2] : memref<1x32xf32, #tpu.memory_space<vmem>>, vector<1x32xf32>
    %c0_3 = arith.constant 0 : index
    %c0_4 = arith.constant 0 : index
    %2 = vector.load %arg3[%c0_3, %c0_4] : memref<1x32xf32, #tpu.memory_space<vmem>>, vector<1x32xf32>
    %cst = arith.constant dense<0.000000e+00> : vector<16xf32>
    %3 = vector.multi_reduction <add>, %0, %cst [1] : vector<16x32xf32> to vector<16xf32>
    %4 = vector.shape_cast %3 : vector<16xf32> to vector<16x1xf32>
    %cst_5 = arith.constant 3.200000e+01 : f32
    %5 = vector.broadcast %cst_5 : f32 to vector<16x1xf32>
    %6 = arith.divf %4, %5 : vector<16x1xf32>
    %7 = vector.broadcast %6 : vector<16x1xf32> to vector<16x32xf32>
    %8 = arith.subf %0, %7 : vector<16x32xf32>
    %9 = arith.mulf %8, %8 : vector<16x32xf32>
    %cst_6 = arith.constant dense<0.000000e+00> : vector<16xf32>
    %10 = vector.multi_reduction <add>, %9, %cst_6 [1] : vector<16x32xf32> to vector<16xf32>
    %11 = vector.shape_cast %10 : vector<16xf32> to vector<16x1xf32>
    %cst_7 = arith.constant 3.200000e+01 : f32
    %12 = vector.broadcast %cst_7 : f32 to vector<16x1xf32>
    %13 = arith.divf %11, %12 : vector<16x1xf32>
    %cst_8 = arith.constant 9.99999996E-13 : f32
    %14 = vector.broadcast %cst_8 : f32 to vector<16x1xf32>
    %15 = arith.addf %13, %14 : vector<16x1xf32>
    %16 = math.rsqrt %15 : vector<16x1xf32>
    %17 = vector.broadcast %16 : vector<16x1xf32> to vector<16x32xf32>
    %18 = arith.mulf %8, %17 : vector<16x32xf32>
    %19 = vector.broadcast %1 : vector<1x32xf32> to vector<16x32xf32>
    %20 = arith.mulf %18, %19 : vector<16x32xf32>
    %21 = vector.broadcast %2 : vector<1x32xf32> to vector<16x32xf32>
    %22 = arith.addf %20, %21 : vector<16x32xf32>
    %23 = arith.truncf %22 : vector<16x32xf32> to vector<16x32xbf16>
    %c0_9 = arith.constant 0 : index
    %c0_10 = arith.constant 0 : index
    %24 = vector.load %arg4[%c0_9, %c0_10] : memref<16x32xbf16, #tpu.memory_space<vmem>>, vector<16x32xbf16>
    tpu.vector_store %arg4[%c0_9, %c0_10], %23 {strides = array<i32>} : memref<16x32xbf16, #tpu.memory_space<vmem>>, vector<16x32xbf16>,
    return
  }
  func.func @transform_0(%arg0: i32) -> (i32, i32) {
    %c0_i32 = arith.constant 0 : i32
    %c0_i32_0 = arith.constant 0 : i32
    return %arg0, %c0_i32 : i32, i32
  }
  func.func @transform_1(%arg0: i32) -> (i32, i32) {
    %c0_i32 = arith.constant 0 : i32
    %c0_i32_0 = arith.constant 0 : i32
    %c0_i32_1 = arith.constant 0 : i32
    return %c0_i32, %c0_i32_0 : i32, i32
  }
  func.func @transform_2(%arg0: i32) -> (i32, i32) {
    %c0_i32 = arith.constant 0 : i32
    %c0_i32_0 = arith.constant 0 : i32
    %c0_i32_1 = arith.constant 0 : i32
    return %c0_i32, %c0_i32_0 : i32, i32
  }
  func.func @transform_3(%arg0: i32) -> (i32, i32) {
    %c0_i32 = arith.constant 0 : i32
    %c0_i32_0 = arith.constant 0 : i32
    return %arg0, %c0_i32 : i32, i32
  }
}

</mosaic_0001>

<bundles_post_ra>
// kernel: tpu_custom_call.1
= control target key start
LH: loop header
LB: loop body
LE: loop exit
PB: predicated region body
PF: predicated region fallthrough
CT: control target
= control target key end

     0   :  { %8 = vsyncpa [#allocation3], 0  ;;  %s774_s0 = inlined_call_operand.hbm [shape: f32[32,32], index: 0, kind: input, shape index: {}]   ;;  %s775_s1 = inlined_call_operand.hbm [shape: f32[1,32], index: 1, kind: input, shape index: {}]   ;;  %s776_s2 = inlined_call_operand.vmem [shape: f32[1,32], index: 2, kind: input, shape index: {}]   ;;  %s777_s3 = inlined_call_operand.hbm [shape: bf16[32,32], index: 3, kind: output, shape index: {}]  }
   0x1   :  { %10 = vsyncpa [#allocation3 + $0x1], 0 }
   0x2   :  { %11 = vsyncpa [#allocation6], 0 }
   0x3   :  { %12 = vsyncpa [#allocation4], 0 }
   0x4   :  { %14 = vsyncpa [#allocation4 + $0x1], 0  ;;  %s624_s12 = smov 0   ;;  %s626_s13 = smov 0  }
   0x5   :  { %s628_s14 = smov 0   ;;  %s630_s15 = smov 0  }
   0x6 LB: > { %s645_s16 = sadd.s32 4294967295, %s596_s15   ;;  %s378_s17 = sadd.s32 4294967294, %s596_s15   ;;  %s596_s15 = sphi %s630_s15, %s788_s15   ;;  %s592_s14 = sphi %s628_s14, %s787_s14   ;;  %s588_s13 = sphi %s626_s13, %s786_s13   ;;  %s584_s12 = sphi %s624_s12, %s785_s12  }
   0x7   : > { %s649_s18 = sadd.s32 1, %s596_s15   ;;  %s27_s19 = sadd.s32 1, %s592_s14 }
   0x8   : > { %s24_s20 = ssub.s32 %s596_s15, %s649_s18  ;;  %p34_p0 = scmp.ne.s32.totalorder %s592_s14, %s588_s13 }
   0x9   : > { %p25_p1 = scmp.eq.s32.totalorder %s24_s20, 0  ;;  %p35_p2 = scmp.eq.s32.totalorder %s596_s15, 0 }
   0xa   : > { %p40_p3 = scmp.ne.s32.totalorder %s588_s13, %s584_s12  ;;  %p41_p4 = scmp.eq.s32.totalorder %s645_s16, 0 }
   0xb   : > { %s661_s21 = scalar_select %p25_p1, %s592_s14, %s27_s19  }
   0xc   : > { %p663_p5 = por %p35_p2, %p34_p0  ;;  %p669_p6 = por %p41_p4, %p40_p3 }
   0xd   : > { %p106_p7 = scmp.eq.s32.totalorder %s645_s16, 1  ;;  %p112_p8 = scmp.eq.s32.totalorder %s378_s17, 1 }
   0xe   : > { %p379_p9 = scmp.ge.s32.totalorder %s596_s15, 1  ;;  %p119_p10 = scmp.lt.s32.totalorder %s596_s15, 3 }
   0xf   : > { %p676_p11 = por %p106_p7, %p34_p0  ;;  %p680_p12 = por %p112_p8, %p40_p3 }
  0x10   : > { %p684_p13 = pnand %p379_p9, %p119_p10  ;;  %s131_s29 = sshll.u32 %s775_s1, 4  ;;  %s132_s29 = int_to_ptr.hbm [resolvable:$true] %s131_s29 }
  0x11   : > { %s598_s30 = smov [#allocation5]   ;;  %p417_p3 = scmp.lt.s32.totalorder %s596_s15, 2 }
  0x12   : > { %p404_p1 = pneg %p684_p13  ;;  %s133_s4 = sshll.u32 %s598_s30, 4  ;;  %s134_s4 = int_to_ptr.vmem [resolvable:$true] %s133_s4 }
  0x13   : > { %s147_s5 = sand.u32 1, %s592_s14   ;;  %p700_p7 = pnand %p417_p3, %p663_p5 }
  0x14   : > { %p405_p2 = pnand %p404_p1, %p41_p4  ;;  %s382_s7 = sshll.u32 %s147_s5, 4 }
  0x15   : > { %s394_s8 = sshll.u32 %s596_s15, 4  ;;  %s151_s19 = scalar_lea.vmem [#allocation2], %s382_s7 }
  0x16   : > { %407 = dma.hbm_to_vmem [thread:$0]  (!%p405_p2), %s132_s29, 16, %s134_s4, [#allocation6]  }
  0x17   : > { %s156_s11 = scalar_lea.hbm %s774_s0, %s394_s8  ;;  %s159_s20 = sshll.u32 %s151_s19, 4  ;;  %s160_s20 = int_to_ptr.vmem [resolvable:$true] %s159_s20 }
  0x18   : > { %s157_s17 = sshll.u32 %s156_s11, 4  ;;  %s148_s27 = scalar_lea.sflag [#allocation3], %s147_s5  ;;  %s158_s17 = int_to_ptr.hbm [resolvable:$true] %s157_s17 }
  0x19   : > { %s496_s28 = sshra.s32 %s158_s17, 4  ;;  %p500_p8 = pneg %p700_p7  ;;  %s497_s28 = int_to_ptr.hbm [resolvable:$true] %s496_s28 }
  0x1a   : > { %s498_s22 = scalar_lea.hbm %s497_s28, 16  ;;  %s503_s4 = scalar_lea.hbm %s774_s0, 32 }
  0x1b   : > { %p499_p5 = scmp.ne.s32.totalorder %s497_s28, %s498_s22  ;;  %p504_p1 = scmp.lt.s32.totalorder %s497_s28, %s774_s0 }
  0x1c   : > { %p505_p2 = scmp.lt.s32.totalorder %s503_s4, %s498_s22 }
  0x1d   : > { %p501_p9 = pnand %p500_p8, %p499_p5 }
  0x1e   : > { %p506_p3 = por %p505_p2, %p504_p1 }
  0x1f   : > { %p502_p10 = pneg %p501_p9 }
  0x21   : > { %p507_p0 = pnand %p506_p3, %p502_p10 }
  0x23   : > { %510 = shalt.err (!%p507_p0)
}
  0x24   : > { %s599_s5 = smov 128   ;;  %s600_s7 = smov 8  }
  0x25   : > { %411 = dma.hbm_to_vmem [thread:$0]  (!%p700_p7), %s158_s17, 256, %s160_s20, %s148_s27, %s599_s5, %s599_s5, %s600_s7  }
  0x26   : > { %171 = sbr.rel (%p684_p13) target bundleno = 329 (0x149), region = 32  ;;  %s721_s10 = sand.u32 (!%p684_p13), 1, %s588_s13  }
  0x27   : > { %s386_s11 = sshll.u32 (!%p684_p13), %s721_s10, 4  ;;  %s174_s19 = scalar_lea.sflag (!%p684_p13), [#allocation3], %s721_s10 }
  0x28   : > { %s177_s28 = scalar_lea.vmem (!%p684_p13), [#allocation2], %s386_s11 }
  0x2b   : > { %571 = dma.done.wait (%p669_p6), %s174_s19, 256  }
  0x2c   : > { %573 = vsyncadd (%p669_p6), %s174_s19, 4294967040 }
  0x2d   : > { %575 = dma.done.wait (%p41_p4), [#allocation6], 16  }
  0x2e   : > { %577 = vsyncadd (%p41_p4), [#allocation6], 4294967280  ;;  %vm212_vm0 = vcmask 261120   ;;  %v208_v0 = vld [vmem:[%s177_s28] sm:$0xff]  ;;  %v209_v2 = vld [vmem:[%s177_s28 + $0x8] sm:$0xff]  ;;  %v601_v4 = vmov 32.0  }
  0x2f   : > { %v213_v1 = vsel %vm212_vm0, %v208_v0, 0.0  ;;  %v216_v3 = vsel %vm212_vm0, %v209_v2, 0.0  ;;  %460 = vrcp.f32 %v601_v4  ;;  %v458_v35 = vld [vmem:[#allocation5] ss:$0 sm:$0xff]  ;;  %s388_s6 = sshll.u32 %s721_s10, 3  ;;  %s395_s17 = sshll.u32 %s645_s16, 3 }
  0x30   : > { %214 = vadd.xlane.f32.xlu0 %v213_v1  ;;  %v459_v38 = vld [vmem:[%s776_s2] ss:$0 sm:$0xff]  ;;  %vm276_vm7 = vcmask 257024   ;;  %s291_s22 = scalar_lea.hbm %s777_s3, %s395_s17  ;;  %s205_s29 = scalar_lea.vmem [#allocation7], %s388_s6 }
  0x31   : > { %s292_s30 = sshll.u32 %s205_s29, 4  ;;  %s294_s4 = sshll.u32 %s291_s22, 4  ;;  %s293_s30 = int_to_ptr.vmem [resolvable:$true] %s292_s30  ;;  %s295_s4 = int_to_ptr.hbm [resolvable:$true] %s294_s4 }
  0x32   : > { %s280_s16 = scalar_lea.sflag [#allocation4], %s721_s10  ;;  %s540_s9 = sshra.s32 %s295_s4, 4  ;;  %s541_s9 = int_to_ptr.hbm [resolvable:$true] %s540_s9 }
  0x33   : > { %s542_s8 = scalar_lea.hbm %s541_s9, 8  ;;  %s546_s11 = scalar_lea.hbm %s777_s3, 16 }
  0x34   : > { %p543_p4 = scmp.ne.s32.totalorder %s541_s9, %s542_s8  ;;  %p547_p0 = scmp.lt.s32.totalorder %s541_s9, %s777_s3 }
  0x35   : > { %v461_v5 = vpop.eup %460  ;;  %p548_p7 = scmp.lt.s32.totalorder %s546_s11, %s542_s8 }
  0x36   : > { %v220_v6 = vmul.f32 32.0, %v461_v5  ;;  %vm224_vm1 = vweird.f32 %v461_v5  ;;  %p544_p6 = pnand %p543_p4, %p676_p11 }
  0x37   : > { %p549_p5 = por %p548_p7, %p547_p0 }
  0x38   : > { %217 = vadd.xlane.f32.xlu0 %v216_v3  ;;  %v221_v7 = vsub.f32 1.0, %v220_v6  ;;  %p545_p13 = pneg %p544_p6 }
  0x3a   : > { %v222_v8 = vmul.f32 %v461_v5, %v221_v7  ;;  %p550_p8 = pnand %p549_p5, %p545_p13 }
  0x3c   : > { %v223_v9 = vadd.f32 %v461_v5, %v222_v8 }
  0x3e   : > { %v225_v10 = vsel %vm224_vm1, %v461_v5, %v223_v9 }
  0xa3   : > { %v215_v11 = vpop.xlane.xlu0 %214 }
  0xa4   : > { %v226_v12 = vmul.f32 %v225_v10, %v215_v11 }
  0xa6   : > { %v228_v13 = vsub.f32 %v208_v0, %v226_v12 }
  0xa8   : > { %v230_v14 = vmul.f32 %v228_v13, %v228_v13 }
  0xaa   : > { %v232_v15 = vsel %vm212_vm0, %v230_v14, 0.0 }
  0xab   : > { %233 = vadd.xlane.f32.xlu1 %v232_v15  ;;  %v218_v16 = vpop.xlane.xlu0 %217 }
  0xac   : > { %v227_v17 = vmul.f32 %v225_v10, %v218_v16 }
  0xae   : > { %v229_v18 = vsub.f32 %v209_v2, %v227_v17 }
  0xb0   : > { %v231_v19 = vmul.f32 %v229_v18, %v229_v18 }
  0xb2   : > { %v235_v20 = vsel %vm212_vm0, %v231_v19, 0.0 }
  0xb3   : > { %236 = vadd.xlane.f32.xlu1 %v235_v20 }
 0x11e   : > { %v234_v21 = vpop.xlane.xlu1 %233 }
 0x11f   : > { %v238_v22 = vmul.f32 %v234_v21, %v225_v10 }
 0x121   : > { %v240_v23 = vadd.f32 1e-12, %v238_v22 }
 0x123   : > { %462 = vrsqrt.f32 %v240_v23  ;;  %vm248_vm3 = vweird.f32 %v240_v23 }
 0x126   : > { %v237_v24 = vpop.xlane.xlu1 %236 }
 0x127   : > { %v239_v25 = vmul.f32 %v237_v24, %v225_v10 }
 0x129   : > { %v463_v26 = vpop.eup %462  ;;  %v241_v27 = vadd.f32 1e-12, %v239_v25 }
 0x12a   : > { %v243_v28 = vmul.f32 %v463_v26, %v240_v23  ;;  %vm249_vm2 = vweird.f32 %v463_v26 }
 0x12b   : > { %464 = vrsqrt.f32 %v241_v27  ;;  %vm250_vm4 = vmor %vm248_vm3, %vm249_vm2  ;;  %vm258_vm6 = vweird.f32 %v241_v27 }
 0x12c   : > { %v244_v29 = vmul.f32 %v463_v26, %v243_v28 }
 0x12e   : > { %v245_v30 = vmul.f32 0.5, %v244_v29 }
 0x130   : > { %v246_v31 = vsub.f32 1.5, %v245_v30 }
 0x131   : > { %v465_v32 = vpop.eup %464 }
 0x132   : > { %v247_v33 = vmul.f32 %v463_v26, %v246_v31  ;;  %v253_v34 = vmul.f32 %v465_v32, %v241_v27  ;;  %vm259_vm5 = vweird.f32 %v465_v32 }
 0x133   : > { %vm260_vm8 = vmor %vm258_vm6, %vm259_vm5 }
 0x134   : > { %v251_v36 = vsel %vm250_vm4, %v463_v26, %v247_v33  ;;  %v254_v37 = vmul.f32 %v465_v32, %v253_v34 }
 0x135   : > { %v262_v39 = vmul.f32 %v251_v36, %v228_v13 }
 0x136   : > { %v255_v40 = vmul.f32 0.5, %v254_v37 }
 0x137   : > { %v267_v41 = vmul.f32 %v458_v35, %v262_v39 }
 0x138   : > { %v256_v42 = vsub.f32 1.5, %v255_v40 }
 0x139   : > { %v272_v43 = vadd.f32 %v459_v38, %v267_v41 }
 0x13a   : > { %v257_v44 = vmul.f32 %v465_v32, %v256_v42 }
 0x13b   : > { %v274_v45 = vpack.c.bf16 %v272_v43, %v272_v43 }
 0x13c   : > { %v261_v46 = vsel %vm260_vm8, %v465_v32, %v257_v44 }
 0x13d   : > { %v263_v47 = vmul.f32 %v261_v46, %v229_v18  ;;  %277 = vst.msk [vmem:[%s205_s29] sm:$0xf] %vm276_vm7, %v274_v45 }
 0x13f   : > { %v268_v48 = vmul.f32 %v458_v35, %v263_v47 }
 0x141   : > { %v273_v49 = vadd.f32 %v459_v38, %v268_v48 }
 0x143   : > { %v275_v50 = vpack.c.bf16 %v273_v49, %v273_v49 }
 0x145   : > { %278 = vst.msk [vmem:[%s205_s29 + $0x4] sm:$0xf] %vm276_vm7, %v275_v50 }
 0x146   : > { %553 = shalt.err (!%p550_p8)
}
 0x147   : > { %s602_s10 = smov 64   ;;  %s603_s23 = smov 4  }
 0x148   : > { %402 = dma.vmem_to_hbm [thread:$0]  (%p676_p11), %s293_s30, 128, %s295_s4, %s280_s16, %s602_s10, %s602_s10, %s603_s23  }
 0x149 PF: > { %s309_s26 = sand.u32 1, %s584_s12   ;;  %p784_p9 = scmp.ge.s32.totalorder %s596_s15, 2 }
 0x14a   : > { %s310_s6 = scalar_lea.sflag [#allocation4], %s309_s26 }
 0x14b   : > { %p413_p10 = pnand %p784_p9, %p680_p12 }
 0x14d   : > { %p414_p1 = pneg %p413_p10 }
 0x14f   : > { %579 = dma.done.wait (%p414_p1), %s310_s6, 128  }
 0x150   : > { %581 = vsyncadd (%p414_p1), %s310_s6, 4294967168  ;;  %p17_p2 = scmp.ge.s32.totalorder %s649_s18, 4   ;;  %s785_s12 = smov %s588_s13 }
 0x151   : > { %s786_s13 = smov %s592_s14  ;;  %s787_s14 = smov %s661_s21 }
 0x152   : > { %s788_s15 = smov %s649_s18  ;;  %19 = sbr.rel (!%p17_p2) target bundleno = 6 (0x6), region = 81 }
 0x157   :  { %316 = vsyncpa [#allocation3], 1 }
 0x158   :  { %318 = vsyncpa [#allocation3 + $0x1], 1 }
 0x159   :  { %319 = vsyncpa [#allocation6], 1 }
 0x15a   :  { %320 = vsyncpa [#allocation4], 1 }
 0x15b   :  { %322 = vsyncpa [#allocation4 + $0x1], 1 }

</bundles_post_ra>
